<compile_context>
chip_gen: v5e
topology: v5e:2x2
jax: 0.10.0
libtpu: 0.0.40
codegen_flags: <defaults>
</compile_context>

<pallas_src>
from functools import partial

import jax
import jax.numpy as jnp
from jax.experimental import pallas as pl
from jax.experimental.pallas import tpu as pltpu


def attention_kernel(x_ref, wqkv_ref, bqkv_ref, wproj_ref, bproj_ref, o_ref, *,
                     seq_len, n_head, scale):
    """One (block_b * T, C) row slab per grid step.

    c_attn as one tall fused GEMM -> per-head causal softmax attention
    (heads addressed by static lane slices of the fused qkv activation)
    -> c_proj accumulated per head into an f32 output slab (no lane concat)."""
    rows, C = x_ref.shape
    T = seq_len
    BB = rows // T
    D = C // n_head
    f32 = jnp.float32
    mxu = wqkv_ref.dtype          # MXU operand dtype (f32 or bf16), set by wrapper

    # ---- c_attn: one tall GEMM over the flattened (batch*seq) rows, f32 acc --
    qkv = jnp.dot(x_ref[...], wqkv_ref[...], preferred_element_type=f32)
    qkv = qkv + bqkv_ref[...].astype(f32)                          # (rows, 3C)

    # fold the 1/sqrt(D) attention scale into q once
    q_scale = jnp.float32(1.0 / (float(D) ** 0.5)) if scale else jnp.float32(1.0)

    # causal mask kept at (1, T, T); jnp.where broadcasts over the batch dim.
    row_i = jax.lax.broadcasted_iota(jnp.int32, (T, T), 0)
    col_i = jax.lax.broadcasted_iota(jnp.int32, (T, T), 1)
    causal = (row_i >= col_i)[None, :, :]
    neg_big = jnp.float32(-10000.0)

    # f32 output accumulator with the c_proj bias folded in once (hoisted).
    y = jnp.broadcast_to(bproj_ref[...].astype(f32), (rows, C))

    for h in range(n_head):
        c0 = h * D
        qh = (qkv[:, c0:c0 + D] * q_scale).reshape(BB, T, D).astype(mxu)
        kh = qkv[:, C + c0:C + c0 + D].reshape(BB, T, D).astype(mxu)
        vh = qkv[:, 2 * C + c0:2 * C + c0 + D].reshape(BB, T, D).astype(mxu)

        # scores (BB, T, T); softmax elementwise math stays f32 on all gens.
        s = jnp.einsum('bqd,bkd->bqk', qh, kh, preferred_element_type=f32)
        s = jnp.where(causal, s, neg_big)              # exact torch.where semantics
        m = jnp.max(s, axis=-1, keepdims=True)
        e = jnp.exp(s - m)
        p = e * pl.reciprocal(jnp.sum(e, axis=-1, keepdims=True), approx=True)

        # attend: (BB, T, D) -> (rows, D)
        ah = jnp.einsum('bqk,bkd->bqd', p.astype(mxu), vh,
                        preferred_element_type=f32).reshape(rows, D)

        # merge_heads + c_proj without the H-way lane concatenate: accumulate
        # this head's rank-D output-projection contribution (sublane-aligned
        # static slice of the resident c_proj weight).
        y = y + jnp.dot(ah.astype(mxu), wproj_ref[c0:c0 + D, :],
                        preferred_element_type=f32)

    o_ref[...] = y.astype(o_ref.dtype)

    # TODO(synk): for D < 128 the per-head q/k/v lane slices are sub-128-lane
    # (masked extracts); at real GPT-2 shapes (D=64, T~1024) restructure to a
    # flash-attention grid (B, H-groups of ceil(128/D) heads, T/tq) with the KV
    # axis innermost/"arbitrary" and online-softmax m/l/acc scratch so slices
    # are 128-lane aligned and the (T, T) scores never materialize.


def _choose_block_b(B, T, target_rows=1024):
    """Largest batch block whose row count stays modest, preferring >=2 grid
    steps (DMA/compute overlap; v7x megacore sharding of the parallel axis)."""
    divisors = [d for d in range(1, B + 1) if B % d == 0]
    fit = [d for d in divisors if d * T <= target_rows] or [1]
    bb = max(fit)
    if B // bb < 2:
        smaller = [d for d in fit if B // d >= 2]
        if smaller:
            bb = max(smaller)
    if (bb * T) % 8 != 0 and bb != B:
        bb = B                     # keep the sublane dim 8-aligned or full-extent
    return bb


def _vmem_limit_bytes(block_rows, T, C, n_head, mm_bytes):
    """Explicit scoped-VMEM budget: single-buffered weights + double-buffered
    activation slabs + in-kernel intermediates, with 2x slack, capped at 48 MiB
    (safe on v5e/v6e and under v7x's 64 MiB physical VMEM)."""
    f32b = 4
    bb = max(1, block_rows // T)
    weights = 4 * C * C * mm_bytes + 4 * C * f32b        # W_qkv + W_proj (1x) + biases
    io = 2 * block_rows * C * (mm_bytes + f32b)          # double-buffered x / out slabs
    inter = block_rows * 3 * C * f32b                    # fused qkv activation
    inter += 4 * bb * n_head * T * T * f32b              # score/exp/prob live range (bound)
    inter += 2 * block_rows * C * f32b                   # y accumulator + per-head temps
    est = weights + io + inter
    return int(min(48 * 1024 * 1024, max(16 * 1024 * 1024, 2 * est)))


def attention_forward(x, wqkv, bqkv, wproj, bproj, *, n_head, scale=False,
                      block_b=None, matmul_dtype=jnp.float32):
    """hidden_states x: (B, T, C); Conv1D weights wqkv (C, 3C) / wproj (C, C),
    biases (1, 3C) / (1, C).  matmul_dtype=jnp.bfloat16 ships bf16 MXU operands
    from the wrapper (half the weight DMA bytes, native bf16 MXU path); all
    accumulation stays f32 inside the kernel and the output keeps x.dtype."""
    B, T, C = x.shape
    assert C % n_head == 0
    out_dtype = x.dtype

    if block_b is None:
        block_b = _choose_block_b(B, T)
    assert B % block_b == 0, "block_b must divide B"
    block_rows = block_b * T
    grid = (B // block_b,)

    # Cast MXU operands in the wrapper (not in-kernel); biases stay f32.
    # Present a lane-dense 2-D (B*T, C) layout at the pallas_call boundary.
    x2d = x.reshape(B * T, C).astype(matmul_dtype)
    wqkv = wqkv.astype(matmul_dtype)
    wproj = wproj.astype(matmul_dtype)
    bqkv = bqkv.astype(jnp.float32)
    bproj = bproj.astype(jnp.float32)

    def resident(shape):
        # constant-index weight/bias: single-buffered (1x VMEM footprint).
        return pl.BlockSpec(shape, lambda i: (0, 0), pipeline_mode=pl.Buffered(1))

    kernel = partial(attention_kernel, seq_len=T, n_head=n_head, scale=scale)
    mm_bytes = jnp.dtype(matmul_dtype).itemsize

    out2d = pl.pallas_call(
        kernel,
        out_shape=jax.ShapeDtypeStruct((B * T, C), out_dtype),
        grid=grid,
        in_specs=[
            pl.BlockSpec((block_rows, C), lambda i: (i, 0)),   # hidden_states rows
            resident((C, 3 * C)),                              # c_attn weight
            resident((1, 3 * C)),                              # c_attn bias
            resident((C, C)),                                  # c_proj weight
            resident((1, C)),                                  # c_proj bias
        ],
        out_specs=pl.BlockSpec((block_rows, C), lambda i: (i, 0)),
        compiler_params=pltpu.CompilerParams(
            dimension_semantics=("parallel",),
            vmem_limit_bytes=_vmem_limit_bytes(block_rows, T, C, n_head, mm_bytes)),
    )(x2d, wqkv, bqkv, wproj, bproj)

    return out2d.reshape(B, T, C)


def attention_reference(x, wqkv, bqkv, wproj, bproj, *, n_head, scale=False):
    """Plain-JAX reference matching the PyTorch forward semantics."""
    B, T, C = x.shape
    D = C // n_head
    qkv = jnp.einsum('btc,cd->btd', x, wqkv) + bqkv[0]
    q, k, v = qkv[..., :C], qkv[..., C:2 * C], qkv[..., 2 * C:]

    def split(z):
        return z.reshape(B, T, n_head, D).transpose(0, 2, 1, 3)

    q, k, v = split(q), split(k), split(v)
    w = jnp.einsum('bhtd,bhsd->bhts', q, k)
    if scale:
        w = w / (jnp.float32(D) ** 0.5)
    causal = jnp.tril(jnp.ones((T, T), dtype=bool))[None, None]
    w = jnp.where(causal, w, jnp.float32(-10000.0))
    p = jax.nn.softmax(w, axis=-1)
    a = jnp.einsum('bhts,bhsd->bhtd', p, v)
    a = a.transpose(0, 2, 1, 3).reshape(B, T, C)
    return jnp.einsum('btc,cd->btd', a, wproj) + bproj[0]


if __name__ == "__main__":
    # Small shapes consistent with the module: nx = C = 32, n_ctx = T = 8,
    # n_head = 4, batch = 2, scale=True (GPT-2 style config).
    B, T, C, H = 2, 8, 32, 4
    scale = True

    key = jax.random.PRNGKey(0)
    kx, kw1, kb1, kw2, kb2 = jax.random.split(key, 5)

    x = jax.random.normal(kx, (B, T, C), dtype=jnp.float32)
    wqkv = 0.02 * jax.random.normal(kw1, (C, 3 * C), dtype=jnp.float32)
    bqkv = 0.01 * jax.random.normal(kb1, (1, 3 * C), dtype=jnp.float32)
    wproj = 0.02 * jax.random.normal(kw2, (C, C), dtype=jnp.float32)
    bproj = 0.01 * jax.random.normal(kb2, (1, C), dtype=jnp.float32)

    # TODO(synk): dropout (attn_pdrop / resid_pdrop), cross-attention (q_attn),
    # layer_past / use_cache, attention_mask / head_mask / output_attentions
    # paths omitted — eval-mode self-attention only.
    ref = attention_reference(x, wqkv, bqkv, wproj, bproj, n_head=H, scale=scale)

    # fp32 MXU-operand path (closest to the torch fp32 reference).
    out = attention_forward(x, wqkv, bqkv, wproj, bproj, n_head=H, scale=scale)
    out = jax.block_until_ready(out)
    assert out.shape == (B, T, C)
    assert jnp.allclose(out, ref, atol=1e-3, rtol=1e-3), "fp32 path mismatch vs reference"

    # bf16 MXU-operand path (wrapper-side casts, f32 accumulation in-kernel).
    out_bf16 = attention_forward(x, wqkv, bqkv, wproj, bproj, n_head=H,
                                 scale=scale, matmul_dtype=jnp.bfloat16)
    out_bf16 = jax.block_until_ready(out_bf16)
    assert jnp.allclose(out_bf16, ref, atol=2e-2, rtol=2e-2), "bf16 path mismatch vs reference"

    print("KERNEL_OK")
</pallas_src>

<mosaic_0001>
module attributes {stable_mosaic.version = 11 : i64} {
  func.func @attention_kernel(%arg0: i32, %arg1: memref<8x32xf32, #tpu.memory_space<vmem>>, %arg2: memref<32x96xf32, #tpu.memory_space<vmem>>, %arg3: memref<1x96xf32, #tpu.memory_space<vmem>>, %arg4: memref<32x32xf32, #tpu.memory_space<vmem>>, %arg5: memref<1x32xf32, #tpu.memory_space<vmem>>, %arg6: memref<8x32xf32, #tpu.memory_space<vmem>>) attributes {dimension_semantics = [#tpu.dimension_semantics<parallel>], iteration_bounds = array<i64: 2>, scalar_prefetch = 0 : i64, scratch_operands = 0 : i64, tpu.core_type = #tpu.core_type<tc>, window_params = [{transform_indices = @transform_0, window_bounds = array<i64: 8, 32>}, {pipeline_mode = #tpu.pipeline_mode<synchronous>, transform_indices = @transform_1, window_bounds = array<i64: 32, 96>}, {pipeline_mode = #tpu.pipeline_mode<synchronous>, transform_indices = @transform_2, window_bounds = array<i64: 1, 96>}, {pipeline_mode = #tpu.pipeline_mode<synchronous>, transform_indices = @transform_3, window_bounds = array<i64: 32, 32>}, {pipeline_mode = #tpu.pipeline_mode<synchronous>, transform_indices = @transform_4, window_bounds = array<i64: 1, 32>}, {transform_indices = @transform_5, window_bounds = array<i64: 8, 32>}]} {
    %c0 = arith.constant 0 : index
    %c0_0 = arith.constant 0 : index
    %0 = vector.load %arg1[%c0, %c0_0] : memref<8x32xf32, #tpu.memory_space<vmem>>, vector<8x32xf32>
    %c0_1 = arith.constant 0 : index
    %c0_2 = arith.constant 0 : index
    %1 = vector.load %arg2[%c0_1, %c0_2] : memref<32x96xf32, #tpu.memory_space<vmem>>, vector<32x96xf32>
    %cst = arith.constant dense<0.000000e+00> : vector<8x96xf32>
    %2 = tpu.matmul %0, %1, %cst {dimension_numbers = #tpu.dot_dimension_numbers<[1], [0], [0], [1], [0, 0, 1, 1], [], []>} : vector<8x32xf32>, vector<32x96xf32>, vector<8x96xf32> -> vector<8x96xf32>
    %c0_3 = arith.constant 0 : index
    %c0_4 = arith.constant 0 : index
    %3 = vector.load %arg3[%c0_3, %c0_4] : memref<1x96xf32, #tpu.memory_space<vmem>>, vector<1x96xf32>
    %4 = vector.broadcast %3 : vector<1x96xf32> to vector<8x96xf32>
    %5 = arith.addf %2, %4 : vector<8x96xf32>
    %6 = tpu.iota {dimensions = array<i32: 0>} : vector<8x8xi32>
    %7 = tpu.iota {dimensions = array<i32: 1>} : vector<8x8xi32>
    %8 = arith.cmpi sge, %6, %7 : vector<8x8xi32>
    %9 = vector.shape_cast %8 : vector<8x8xi1> to vector<1x8x8xi1>
    %c0_5 = arith.constant 0 : index
    %c0_6 = arith.constant 0 : index
    %10 = vector.load %arg5[%c0_5, %c0_6] : memref<1x32xf32, #tpu.memory_space<vmem>>, vector<1x32xf32>
    %11 = vector.shape_cast %10 : vector<1x32xf32> to vector<1x32xf32>
    %12 = vector.broadcast %11 : vector<1x32xf32> to vector<8x32xf32>
    %13 = vector.extract_strided_slice %5 {offsets = [0, 0], sizes = [8, 8], strides = [1, 1]} : vector<8x96xf32> to vector<8x8xf32>
    %cst_7 = arith.constant 0.353553385 : f32
    %14 = vector.broadcast %cst_7 : f32 to vector<8x8xf32>
    %15 = arith.mulf %13, %14 : vector<8x8xf32>
    %16 = vector.shape_cast %15 : vector<8x8xf32> to vector<1x8x8xf32>
    %17 = vector.extract_strided_slice %5 {offsets = [0, 32], sizes = [8, 8], strides = [1, 1]} : vector<8x96xf32> to vector<8x8xf32>
    %18 = vector.shape_cast %17 : vector<8x8xf32> to vector<1x8x8xf32>
    %19 = vector.extract_strided_slice %5 {offsets = [0, 64], sizes = [8, 8], strides = [1, 1]} : vector<8x96xf32> to vector<8x8xf32>
    %20 = vector.shape_cast %19 : vector<8x8xf32> to vector<1x8x8xf32>
    "tpu.trace_start"() <{level = 10 : i32, message = "bqd,bkd->bqk"}> : () -> ()
    %cst_8 = arith.constant dense<0.000000e+00> : vector<1x8x8xf32>
    %21 = tpu.matmul %16, %18, %cst_8 {dimension_numbers = #tpu.dot_dimension_numbers<[2], [2], [1], [1], [0, 0, 0, 1, 1, 1], [0], [0]>} : vector<1x8x8xf32>, vector<1x8x8xf32>, vector<1x8x8xf32> -> vector<1x8x8xf32>
    %cst_9 = arith.constant -1.000000e+04 : f32
    "tpu.trace_stop"() : () -> ()
    %22 = vector.broadcast %cst_9 : f32 to vector<1x8x8xf32>
    %23 = arith.select %9, %21, %22 : vector<1x8x8xi1>, vector<1x8x8xf32>
    %cst_10 = arith.constant dense<0xFF800000> : vector<1x8xf32>
    %24 = vector.multi_reduction <maximumf>, %23, %cst_10 [2] : vector<1x8x8xf32> to vector<1x8xf32>
    %25 = vector.shape_cast %24 : vector<1x8xf32> to vector<1x8x1xf32>
    %26 = vector.broadcast %25 : vector<1x8x1xf32> to vector<1x8x8xf32>
    %27 = arith.subf %23, %26 : vector<1x8x8xf32>
    %28 = math.exp %27 : vector<1x8x8xf32>
    %cst_11 = arith.constant dense<0.000000e+00> : vector<1x8xf32>
    %29 = vector.multi_reduction <add>, %28, %cst_11 [2] : vector<1x8x8xf32> to vector<1x8xf32>
    %30 = vector.shape_cast %29 : vector<1x8xf32> to vector<1x8x1xf32>
    %31 = tpu.reciprocal %30 {approx = true} : vector<1x8x1xf32> -> vector<1x8x1xf32>
    %32 = vector.broadcast %31 : vector<1x8x1xf32> to vector<1x8x8xf32>
    %33 = arith.mulf %28, %32 : vector<1x8x8xf32>
    "tpu.trace_start"() <{level = 10 : i32, message = "bqk,bkd->bqd"}> : () -> ()
    %cst_12 = arith.constant dense<0.000000e+00> : vector<1x8x8xf32>
    %34 = tpu.matmul %33, %20, %cst_12 {dimension_numbers = #tpu.dot_dimension_numbers<[2], [1], [1], [2], [0, 0, 0, 1, 1, 2], [0], [0]>} : vector<1x8x8xf32>, vector<1x8x8xf32>, vector<1x8x8xf32> -> vector<1x8x8xf32>
    "tpu.trace_stop"() : () -> ()
    %35 = vector.shape_cast %34 : vector<1x8x8xf32> to vector<8x8xf32>
    %c0_13 = arith.constant 0 : index
    %c0_14 = arith.constant 0 : index
    %36 = vector.load %arg4[%c0_13, %c0_14] : memref<32x32xf32, #tpu.memory_space<vmem>>, vector<8x32xf32>
    %cst_15 = arith.constant dense<0.000000e+00> : vector<8x32xf32>
    %37 = tpu.matmul %35, %36, %cst_15 {dimension_numbers = #tpu.dot_dimension_numbers<[1], [0], [0], [1], [0, 0, 1, 1], [], []>} : vector<8x8xf32>, vector<8x32xf32>, vector<8x32xf32> -> vector<8x32xf32>
    %38 = arith.addf %12, %37 : vector<8x32xf32>
    %39 = vector.extract_strided_slice %5 {offsets = [0, 8], sizes = [8, 8], strides = [1, 1]} : vector<8x96xf32> to vector<8x8xf32>
    %cst_16 = arith.constant 0.353553385 : f32
    %40 = vector.broadcast %cst_16 : f32 to vector<8x8xf32>
    %41 = arith.mulf %39, %40 : vector<8x8xf32>
    %42 = vector.shape_cast %41 : vector<8x8xf32> to vector<1x8x8xf32>
    %43 = vector.extract_strided_slice %5 {offsets = [0, 40], sizes = [8, 8], strides = [1, 1]} : vector<8x96xf32> to vector<8x8xf32>
    %44 = vector.shape_cast %43 : vector<8x8xf32> to vector<1x8x8xf32>
    %45 = vector.extract_strided_slice %5 {offsets = [0, 72], sizes = [8, 8], strides = [1, 1]} : vector<8x96xf32> to vector<8x8xf32>
    %46 = vector.shape_cast %45 : vector<8x8xf32> to vector<1x8x8xf32>
    "tpu.trace_start"() <{level = 10 : i32, message = "bqd,bkd->bqk"}> : () -> ()
    %cst_17 = arith.constant dense<0.000000e+00> : vector<1x8x8xf32>
    %47 = tpu.matmul %42, %44, %cst_17 {dimension_numbers = #tpu.dot_dimension_numbers<[2], [2], [1], [1], [0, 0, 0, 1, 1, 1], [0], [0]>} : vector<1x8x8xf32>, vector<1x8x8xf32>, vector<1x8x8xf32> -> vector<1x8x8xf32>
    %cst_18 = arith.constant -1.000000e+04 : f32
    "tpu.trace_stop"() : () -> ()
    %48 = vector.broadcast %cst_18 : f32 to vector<1x8x8xf32>
    %49 = arith.select %9, %47, %48 : vector<1x8x8xi1>, vector<1x8x8xf32>
    %cst_19 = arith.constant dense<0xFF800000> : vector<1x8xf32>
    %50 = vector.multi_reduction <maximumf>, %49, %cst_19 [2] : vector<1x8x8xf32> to vector<1x8xf32>
    %51 = vector.shape_cast %50 : vector<1x8xf32> to vector<1x8x1xf32>
    %52 = vector.broadcast %51 : vector<1x8x1xf32> to vector<1x8x8xf32>
    %53 = arith.subf %49, %52 : vector<1x8x8xf32>
    %54 = math.exp %53 : vector<1x8x8xf32>
    %cst_20 = arith.constant dense<0.000000e+00> : vector<1x8xf32>
    %55 = vector.multi_reduction <add>, %54, %cst_20 [2] : vector<1x8x8xf32> to vector<1x8xf32>
    %56 = vector.shape_cast %55 : vector<1x8xf32> to vector<1x8x1xf32>
    %57 = tpu.reciprocal %56 {approx = true} : vector<1x8x1xf32> -> vector<1x8x1xf32>
    %58 = vector.broadcast %57 : vector<1x8x1xf32> to vector<1x8x8xf32>
    %59 = arith.mulf %54, %58 : vector<1x8x8xf32>
    "tpu.trace_start"() <{level = 10 : i32, message = "bqk,bkd->bqd"}> : () -> ()
    %cst_21 = arith.constant dense<0.000000e+00> : vector<1x8x8xf32>
    %60 = tpu.matmul %59, %46, %cst_21 {dimension_numbers = #tpu.dot_dimension_numbers<[2], [1], [1], [2], [0, 0, 0, 1, 1, 2], [0], [0]>} : vector<1x8x8xf32>, vector<1x8x8xf32>, vector<1x8x8xf32> -> vector<1x8x8xf32>
    "tpu.trace_stop"() : () -> ()
    %61 = vector.shape_cast %60 : vector<1x8x8xf32> to vector<8x8xf32>
    %c8 = arith.constant 8 : index
    %c0_22 = arith.constant 0 : index
    %62 = vector.load %arg4[%c8, %c0_22] : memref<32x32xf32, #tpu.memory_space<vmem>>, vector<8x32xf32>
    %cst_23 = arith.constant dense<0.000000e+00> : vector<8x32xf32>
    %63 = tpu.matmul %61, %62, %cst_23 {dimension_numbers = #tpu.dot_dimension_numbers<[1], [0], [0], [1], [0, 0, 1, 1], [], []>} : vector<8x8xf32>, vector<8x32xf32>, vector<8x32xf32> -> vector<8x32xf32>
    %64 = arith.addf %38, %63 : vector<8x32xf32>
    %65 = vector.extract_strided_slice %5 {offsets = [0, 16], sizes = [8, 8], strides = [1, 1]} : vector<8x96xf32> to vector<8x8xf32>
    %cst_24 = arith.constant 0.353553385 : f32
    %66 = vector.broadcast %cst_24 : f32 to vector<8x8xf32>
    %67 = arith.mulf %65, %66 : vector<8x8xf32>
    %68 = vector.shape_cast %67 : vector<8x8xf32> to vector<1x8x8xf32>
    %69 = vector.extract_strided_slice %5 {offsets = [0, 48], sizes = [8, 8], strides = [1, 1]} : vector<8x96xf32> to vector<8x8xf32>
    %70 = vector.shape_cast %69 : vector<8x8xf32> to vector<1x8x8xf32>
    %71 = vector.extract_strided_slice %5 {offsets = [0, 80], sizes = [8, 8], strides = [1, 1]} : vector<8x96xf32> to vector<8x8xf32>
    %72 = vector.shape_cast %71 : vector<8x8xf32> to vector<1x8x8xf32>
    "tpu.trace_start"() <{level = 10 : i32, message = "bqd,bkd->bqk"}> : () -> ()
    %cst_25 = arith.constant dense<0.000000e+00> : vector<1x8x8xf32>
    %73 = tpu.matmul %68, %70, %cst_25 {dimension_numbers = #tpu.dot_dimension_numbers<[2], [2], [1], [1], [0, 0, 0, 1, 1, 1], [0], [0]>} : vector<1x8x8xf32>, vector<1x8x8xf32>, vector<1x8x8xf32> -> vector<1x8x8xf32>
    %cst_26 = arith.constant -1.000000e+04 : f32
    "tpu.trace_stop"() : () -> ()
    %74 = vector.broadcast %cst_26 : f32 to vector<1x8x8xf32>
    %75 = arith.select %9, %73, %74 : vector<1x8x8xi1>, vector<1x8x8xf32>
    %cst_27 = arith.constant dense<0xFF800000> : vector<1x8xf32>
    %76 = vector.multi_reduction <maximumf>, %75, %cst_27 [2] : vector<1x8x8xf32> to vector<1x8xf32>
    %77 = vector.shape_cast %76 : vector<1x8xf32> to vector<1x8x1xf32>
    %78 = vector.broadcast %77 : vector<1x8x1xf32> to vector<1x8x8xf32>
    %79 = arith.subf %75, %78 : vector<1x8x8xf32>
    %80 = math.exp %79 : vector<1x8x8xf32>
    %cst_28 = arith.constant dense<0.000000e+00> : vector<1x8xf32>
    %81 = vector.multi_reduction <add>, %80, %cst_28 [2] : vector<1x8x8xf32> to vector<1x8xf32>
    %82 = vector.shape_cast %81 : vector<1x8xf32> to vector<1x8x1xf32>
    %83 = tpu.reciprocal %82 {approx = true} : vector<1x8x1xf32> -> vector<1x8x1xf32>
    %84 = vector.broadcast %83 : vector<1x8x1xf32> to vector<1x8x8xf32>
    %85 = arith.mulf %80, %84 : vector<1x8x8xf32>
    "tpu.trace_start"() <{level = 10 : i32, message = "bqk,bkd->bqd"}> : () -> ()
    %cst_29 = arith.constant dense<0.000000e+00> : vector<1x8x8xf32>
    %86 = tpu.matmul %85, %72, %cst_29 {dimension_numbers = #tpu.dot_dimension_numbers<[2], [1], [1], [2], [0, 0, 0, 1, 1, 2], [0], [0]>} : vector<1x8x8xf32>, vector<1x8x8xf32>, vector<1x8x8xf32> -> vector<1x8x8xf32>
    "tpu.trace_stop"() : () -> ()
    %87 = vector.shape_cast %86 : vector<1x8x8xf32> to vector<8x8xf32>
    %c16 = arith.constant 16 : index
    %c0_30 = arith.constant 0 : index
    %88 = vector.load %arg4[%c16, %c0_30] : memref<32x32xf32, #tpu.memory_space<vmem>>, vector<8x32xf32>
    %cst_31 = arith.constant dense<0.000000e+00> : vector<8x32xf32>
    %89 = tpu.matmul %87, %88, %cst_31 {dimension_numbers = #tpu.dot_dimension_numbers<[1], [0], [0], [1], [0, 0, 1, 1], [], []>} : vector<8x8xf32>, vector<8x32xf32>, vector<8x32xf32> -> vector<8x32xf32>
    %90 = arith.addf %64, %89 : vector<8x32xf32>
    %91 = vector.extract_strided_slice %5 {offsets = [0, 24], sizes = [8, 8], strides = [1, 1]} : vector<8x96xf32> to vector<8x8xf32>
    %cst_32 = arith.constant 0.353553385 : f32
    %92 = vector.broadcast %cst_32 : f32 to vector<8x8xf32>
    %93 = arith.mulf %91, %92 : vector<8x8xf32>
    %94 = vector.shape_cast %93 : vector<8x8xf32> to vector<1x8x8xf32>
    %95 = vector.extract_strided_slice %5 {offsets = [0, 56], sizes = [8, 8], strides = [1, 1]} : vector<8x96xf32> to vector<8x8xf32>
    %96 = vector.shape_cast %95 : vector<8x8xf32> to vector<1x8x8xf32>
    %97 = vector.extract_strided_slice %5 {offsets = [0, 88], sizes = [8, 8], strides = [1, 1]} : vector<8x96xf32> to vector<8x8xf32>
    %98 = vector.shape_cast %97 : vector<8x8xf32> to vector<1x8x8xf32>
    "tpu.trace_start"() <{level = 10 : i32, message = "bqd,bkd->bqk"}> : () -> ()
    %cst_33 = arith.constant dense<0.000000e+00> : vector<1x8x8xf32>
    %99 = tpu.matmul %94, %96, %cst_33 {dimension_numbers = #tpu.dot_dimension_numbers<[2], [2], [1], [1], [0, 0, 0, 1, 1, 1], [0], [0]>} : vector<1x8x8xf32>, vector<1x8x8xf32>, vector<1x8x8xf32> -> vector<1x8x8xf32>
    %cst_34 = arith.constant -1.000000e+04 : f32
    "tpu.trace_stop"() : () -> ()
    %100 = vector.broadcast %cst_34 : f32 to vector<1x8x8xf32>
    %101 = arith.select %9, %99, %100 : vector<1x8x8xi1>, vector<1x8x8xf32>
    %cst_35 = arith.constant dense<0xFF800000> : vector<1x8xf32>
    %102 = vector.multi_reduction <maximumf>, %101, %cst_35 [2] : vector<1x8x8xf32> to vector<1x8xf32>
    %103 = vector.shape_cast %102 : vector<1x8xf32> to vector<1x8x1xf32>
    %104 = vector.broadcast %103 : vector<1x8x1xf32> to vector<1x8x8xf32>
    %105 = arith.subf %101, %104 : vector<1x8x8xf32>
    %106 = math.exp %105 : vector<1x8x8xf32>
    %cst_36 = arith.constant dense<0.000000e+00> : vector<1x8xf32>
    %107 = vector.multi_reduction <add>, %106, %cst_36 [2] : vector<1x8x8xf32> to vector<1x8xf32>
    %108 = vector.shape_cast %107 : vector<1x8xf32> to vector<1x8x1xf32>
    %109 = tpu.reciprocal %108 {approx = true} : vector<1x8x1xf32> -> vector<1x8x1xf32>
    %110 = vector.broadcast %109 : vector<1x8x1xf32> to vector<1x8x8xf32>
    %111 = arith.mulf %106, %110 : vector<1x8x8xf32>
    "tpu.trace_start"() <{level = 10 : i32, message = "bqk,bkd->bqd"}> : () -> ()
    %cst_37 = arith.constant dense<0.000000e+00> : vector<1x8x8xf32>
    %112 = tpu.matmul %111, %98, %cst_37 {dimension_numbers = #tpu.dot_dimension_numbers<[2], [1], [1], [2], [0, 0, 0, 1, 1, 2], [0], [0]>} : vector<1x8x8xf32>, vector<1x8x8xf32>, vector<1x8x8xf32> -> vector<1x8x8xf32>
    "tpu.trace_stop"() : () -> ()
    %113 = vector.shape_cast %112 : vector<1x8x8xf32> to vector<8x8xf32>
    %c24 = arith.constant 24 : index
    %c0_38 = arith.constant 0 : index
    %114 = vector.load %arg4[%c24, %c0_38] : memref<32x32xf32, #tpu.memory_space<vmem>>, vector<8x32xf32>
    %cst_39 = arith.constant dense<0.000000e+00> : vector<8x32xf32>
    %115 = tpu.matmul %113, %114, %cst_39 {dimension_numbers = #tpu.dot_dimension_numbers<[1], [0], [0], [1], [0, 0, 1, 1], [], []>} : vector<8x8xf32>, vector<8x32xf32>, vector<8x32xf32> -> vector<8x32xf32>
    %116 = arith.addf %90, %115 : vector<8x32xf32>
    %c0_40 = arith.constant 0 : index
    %c0_41 = arith.constant 0 : index
    %117 = vector.load %arg6[%c0_40, %c0_41] : memref<8x32xf32, #tpu.memory_space<vmem>>, vector<8x32xf32>
    tpu.vector_store %arg6[%c0_40, %c0_41], %116 {strides = array<i32>} : memref<8x32xf32, #tpu.memory_space<vmem>>, vector<8x32xf32>,
    return
  }
  func.func @transform_0(%arg0: i32) -> (i32, i32) {
    %c0_i32 = arith.constant 0 : i32
    %c0_i32_0 = arith.constant 0 : i32
    return %arg0, %c0_i32 : i32, i32
  }
  func.func @transform_1(%arg0: i32) -> (i32, i32) {
    %c0_i32 = arith.constant 0 : i32
    %c0_i32_0 = arith.constant 0 : i32
    %c0_i32_1 = arith.constant 0 : i32
    return %c0_i32, %c0_i32_0 : i32, i32
  }
  func.func @transform_2(%arg0: i32) -> (i32, i32) {
    %c0_i32 = arith.constant 0 : i32
    %c0_i32_0 = arith.constant 0 : i32
    %c0_i32_1 = arith.constant 0 : i32
    return %c0_i32, %c0_i32_0 : i32, i32
  }
  func.func @transform_3(%arg0: i32) -> (i32, i32) {
    %c0_i32 = arith.constant 0 : i32
    %c0_i32_0 = arith.constant 0 : i32
    %c0_i32_1 = arith.constant 0 : i32
    return %c0_i32, %c0_i32_0 : i32, i32
  }
  func.func @transform_4(%arg0: i32) -> (i32, i32) {
    %c0_i32 = arith.constant 0 : i32
    %c0_i32_0 = arith.constant 0 : i32
    %c0_i32_1 = arith.constant 0 : i32
    return %c0_i32, %c0_i32_0 : i32, i32
  }
  func.func @transform_5(%arg0: i32) -> (i32, i32) {
    %c0_i32 = arith.constant 0 : i32
    %c0_i32_0 = arith.constant 0 : i32
    return %arg0, %c0_i32 : i32, i32
  }
}

</mosaic_0001>

<bundles_post_ra>
// kernel: tpu_custom_call.1
= control target key start
LH: loop header
LB: loop body
LE: loop exit
PB: predicated region body
PF: predicated region fallthrough
CT: control target
= control target key end

     0   :  { %10 = vsyncpa [#allocation3], 0  ;;  %s1337_s0 = inlined_call_operand.hbm [shape: f32[16,32], index: 0, kind: input, shape index: {}]   ;;  %s1338_s1 = inlined_call_operand.hbm [shape: f32[32,96], index: 1, kind: input, shape index: {}]   ;;  %s1339_s2 = inlined_call_operand.vmem [shape: f32[1,96], index: 2, kind: input, shape index: {}]   ;;  %s1340_s3 = inlined_call_operand.hbm [shape: f32[32,32], index: 3, kind: input, shape index: {}]   ;;  %s1341_s4 = inlined_call_operand.vmem [shape: f32[1,32], index: 4, kind: input, shape index: {}]   ;;  %s1342_s5 = inlined_call_operand.hbm [shape: f32[16,32], index: 5, kind: output, shape index: {}]  }
   0x1   :  { %12 = vsyncpa [#allocation3 + $0x1], 0 }
   0x2   :  { %13 = vsyncpa [#allocation6], 0 }
   0x3   :  { %14 = vsyncpa [#allocation4], 0 }
   0x4   :  { %16 = vsyncpa [#allocation4 + $0x1], 0  ;;  %s1127_s18 = smov 0   ;;  %s1129_s19 = smov 0  }
   0x5   :  { %s1131_s20 = smov 0   ;;  %s1133_s21 = smov 0  }
   0x6 LB: > { %s174_s24 = sshll.u32 %s1338_s1, 4  ;;  %s1151_s25 = sadd.s32 4294967295, %s1080_s21   ;;  %s1080_s21 = sphi %s1133_s21, %s1353_s21   ;;  %s1076_s20 = sphi %s1131_s20, %s1352_s20   ;;  %s1072_s19 = sphi %s1129_s19, %s1351_s19   ;;  %s1068_s18 = sphi %s1127_s18, %s1350_s18   ;;  %s175_s24 = int_to_ptr.hbm [resolvable:$true] %s174_s24 }
   0x7   : > { %p790_p0 = scmp.ge.s32.totalorder %s1080_s21, 1  ;;  %p43_p1 = scmp.eq.s32.totalorder %s1151_s25, 0 }
   0x8   : > { %p163_p2 = scmp.lt.s32.totalorder %s1080_s21, 3  ;;  %s1082_s27 = smov [#allocation5]  }
   0x9   : > { %s176_s28 = sshll.u32 %s1082_s27, 4  ;;  %s191_s6 = sshll.u32 %s1340_s3, 4  ;;  %s177_s28 = int_to_ptr.vmem [resolvable:$true] %s176_s28  ;;  %s192_s6 = int_to_ptr.hbm [resolvable:$true] %s191_s6 }
   0xa   : > { %p1156_p3 = pnand %p790_p0, %p163_p2  ;;  %s1083_s7 = smov [#allocation7]  }
   0xb   : > { %s193_s8 = sshll.u32 %s1083_s7, 4  ;;  %s1084_s9 = smov 128   ;;  %s194_s8 = int_to_ptr.vmem [resolvable:$true] %s193_s8 }
   0xc   : > { %p834_p4 = pneg %p1156_p3  ;;  %s1085_s10 = smov 8  }
   0xd   : > { %s789_s11 = sadd.s32 4294967294, %s1080_s21   ;;  %s1170_s12 = sadd.s32 1, %s1080_s21  }
   0xe   : > { %p835_p6 = pnand %p834_p4, %p43_p1  ;;  %s26_s13 = ssub.s32 %s1080_s21, %s1170_s12 }
   0xf   : > { %s29_s14 = sadd.s32 1, %s1076_s20  ;;  %p27_p7 = scmp.eq.s32.totalorder %s26_s13, 0 }
  0x10   : > { %837 = dma.hbm_to_vmem [thread:$0]  (!%p835_p6), %s175_s24, 512, %s177_s28, [#allocation6], %s1084_s9, %s1084_s9, %s1085_s10  }
  0x11   : > { %840 = dma.hbm_to_vmem [thread:$0]  (!%p835_p6), %s192_s6, 512, %s194_s8, [#allocation6], %s1084_s9, %s1084_s9, %s1085_s10  }
  0x12   : > { %p36_p8 = scmp.ne.s32.totalorder %s1076_s20, %s1072_s19  ;;  %p37_p9 = scmp.eq.s32.totalorder %s1080_s21, 0 }
  0x13   : > { %p42_p10 = scmp.ne.s32.totalorder %s1072_s19, %s1068_s18  ;;  %p150_p13 = scmp.eq.s32.totalorder %s1151_s25, 1 }
  0x14   : > { %s1181_s15 = scalar_select %p27_p7, %s1076_s20, %s29_s14  }
  0x15   : > { %p1183_p11 = por %p37_p9, %p36_p8  ;;  %p1189_p12 = por %p43_p1, %p42_p10 }
  0x16   : > { %p156_p0 = scmp.eq.s32.totalorder %s789_s11, 1  ;;  %p851_p2 = scmp.lt.s32.totalorder %s1080_s21, 2 }
  0x17   : > { %s210_s22 = sand.u32 1, %s1076_s20   ;;  %p1196_p4 = por %p150_p13, %p36_p8 }
  0x18   : > { %p1200_p6 = por %p156_p0, %p42_p10  ;;  %s794_s27 = sshll.u32 %s210_s22, 3 }
  0x19   : > { %s795_s28 = sshll.u32 %s1080_s21, 3  ;;  %s214_s7 = scalar_lea.vmem [#allocation2], %s794_s27 }
  0x1a   : > { %s218_s6 = scalar_lea.hbm %s1337_s0, %s795_s28  ;;  %s222_s8 = sshll.u32 %s214_s7, 4  ;;  %s223_s8 = int_to_ptr.vmem [resolvable:$true] %s222_s8 }
  0x1b   : > { %s220_s9 = sshll.u32 %s218_s6, 4  ;;  %p1210_p7 = pnand %p851_p2, %p1183_p11  ;;  %s221_s9 = int_to_ptr.hbm [resolvable:$true] %s220_s9 }
  0x1c   : > { %s211_s11 = scalar_lea.sflag [#allocation3], %s210_s22  ;;  %s980_s13 = sshra.s32 %s221_s9, 4  ;;  %s981_s13 = int_to_ptr.hbm [resolvable:$true] %s980_s13 }
  0x1d   : > { %s982_s14 = scalar_lea.hbm %s981_s13, 8  ;;  %p984_p9 = pneg %p1210_p7 }
  0x1e   : > { %p983_p8 = scmp.ne.s32.totalorder %s981_s13, %s982_s14  ;;  %s987_s29 = scalar_lea.hbm %s1337_s0, 16 }
  0x1f   : > { %p988_p11 = scmp.lt.s32.totalorder %s981_s13, %s1337_s0  ;;  %p989_p0 = scmp.lt.s32.totalorder %s987_s29, %s982_s14 }
  0x20   : > { %p985_p10 = pnand %p984_p9, %p983_p8 }
  0x21   : > { %p990_p2 = por %p989_p0, %p988_p11 }
  0x22   : > { %p986_p13 = pneg %p985_p10 }
  0x24   : > { %p991_p5 = pnand %p990_p2, %p986_p13 }
  0x26   : > { %994 = shalt.err (!%p991_p5)
}
  0x27   : > { %844 = dma.hbm_to_vmem [thread:$0]  (!%p1210_p7), %s221_s9, 128, %s223_s8, %s211_s11  }
  0x28   : > { %231 = sbr.rel (%p1156_p3) target bundleno = 1878 (0x756), region = 40  ;;  %s1227_s22 = sand.u32 (!%p1156_p3), 1, %s1072_s19  }
  0x29   : > { %s797_s6 = sshll.u32 (!%p1156_p3), %s1227_s22, 3  ;;  %s234_s7 = scalar_lea.sflag (!%p1156_p3), [#allocation3], %s1227_s22 }
  0x2a   : > { %s237_s13 = scalar_lea.vmem (!%p1156_p3), [#allocation2], %s797_s6 }
  0x2d   : > { %1055 = dma.done.wait (%p1189_p12), %s234_s7, 128  }
  0x2e   : > { %1057 = vsyncadd (%p1189_p12), %s234_s7, 4294967168 }
  0x2f   : > { %1059 = dma.done.wait (%p43_p1), [#allocation6], 1024  }
  0x30   : > { %1061 = vsyncadd (%p43_p1), [#allocation6], 4294966272  ;;  %v279_v0 = vld [vmem:[#allocation5 + $0x18] sm:$0xff]  ;;  %v278_v1 = vld [vmem:[#allocation5 + $0x10] sm:$0xff]  ;;  %vm284_vm0 = vcmask 261120   ;;  %s1086_s8 = smov 88   ;;  %v308_v10 = vlaneseq }
  0x31   : > { %300 = vmatpush.msra.mxu0 %v279_v0  ;;  %v277_v2 = vld [vmem:[#allocation5 + $0x8] sm:$0xff]  ;;  %v276_v3 = vld [vmem:[#allocation5] sm:$0xff]  ;;  %v275_v4 = vld [vmem:[%s237_s13] sm:$0xff]  ;;  %s1087_s9 = smov 96   ;;  %s1088_s10 = smov 120   ;;  %vm321_vm1 = vcmask 64512  }
  0x32   : > { %v902_v5 = vld [vmem:[%s1339_s2] ss:$0 sm:$0xff]  ;;  %v1252_v11 = vshrl.u32 %v308_v10, 7  ;;  %v1254_v12 = vand.u32 127, %v308_v10  ;;  %s1089_s11 = smov 56   ;;  %s1090_s14 = smov 112  }
  0x33   : > { %301 = vmatpush.msra.mxu0 %v278_v1  ;;  %s1091_s27 = smov 104   ;;  %v385_v16 = vld [vmem:[#allocation7] sm:$0xff]  ;;  %s1092_s28 = smov 64   ;;  %v476_v40 = vld [vmem:[#allocation7 + $0x8] sm:$0xff] }
  0x34   : > { %vm312_vm2 = vcmp.ge.s32.totalorder %v1252_v11, %v1254_v12  ;;  %404 = vmatpush.msra.mxu3 %v385_v16  ;;  %s1093_s29 = smov 80   ;;  %s1094_s30 = smov 72   ;;  %v658_v12 = vld [vmem:[#allocation7 + $0x18] sm:$0xff] }
  0x35   : > { %302 = vmatpush.msra.mxu0 %v277_v2  ;;  %s1095_s16 = smov 48   ;;  %s1096_s7 = smov 40  }
  0x36   : > { %s819_s17 = sshll.u32 %s1151_s25, 3  ;;  %s685_s25 = scalar_lea.sflag [#allocation4], %s1227_s22 }
  0x37   : > { %303 = vmatpush.msra.mxu0 %v276_v3 }
  0x38   : > { %801 = vmatmul.msk.f32.vlgmr.msra.gmra.mxu0 %vm284_vm0, %v275_v4 }
  0xb5   : > { %v305_v6 = vpop.f32.mrf.mxu0 }
  0xb6   : > { %v1245_v7 = vadd.f32 %v902_v5, %v305_v6  ;;  %v567_v5 = vld [vmem:[#allocation7 + $0x10] sm:$0xff] }
  0xb8   : > { %412 = vrot.lane.b32.xlu2 %v1245_v7, %s1086_s8  ;;  %319 = vrot.lane.b32.xlu0 %v1245_v7, %s1087_s9  ;;  %v317_v8 = vmul.f32 0.35355338, %v1245_v7 }
  0xc0   : > { %410 = vrot.lane.b32.xlu2 %v317_v8, %s1088_s10  ;;  %s695_s10 = scalar_lea.hbm %s1342_s5, %s819_s17 }
 0x112   : > { %v413_v25 = vpop.permute.xlu2 %412 }
 0x11a   : > { %v411_v28 = vpop.permute.xlu2 %410 }
 0x12a   : > { %v320_v9 = vpop.permute.xlu0 %319 }
 0x12b   : > { %802 = vmatpush.xpose.msk.msra.mxu1 %vm321_vm1, %v320_v9 }
 0x12e   : > { %803 = vmatmul.msk.f32.vlgmr.msra.gmra.mxu1 %vm321_vm1, %v317_v8 }
 0x12f   : > { %495 = vmatpush.msrb.mxu1 %v476_v40 }
 0x1ab   : > { %v344_v13 = vpop.f32.mrf.mxu1 }
 0x1ac   : > { %v347_v14 = vsel %vm312_vm2, %v344_v13, -10000.0 }
 0x1ad   : > { %v348_v15 = vsel %vm321_vm1, %v347_v14, -inf }
 0x1ae   : > { %349 = vmax.xlane.f32.xlu0 %v348_v15 }
 0x1c2   : > { %450 = vrot.lane.b32.xlu0 %v1245_v7, %s1089_s11  ;;  %s274_s11 = scalar_lea.vmem [#allocation8], %s797_s6  ;;  %s1030_s6 = scalar_lea.hbm %s1342_s5, 16 }
 0x1ca   : > { %501 = vrot.lane.b32.xlu0 %v317_v8, %s1090_s14  ;;  %s697_s14 = sshll.u32 %s274_s11, 4  ;;  %s698_s14 = int_to_ptr.vmem [resolvable:$true] %s697_s14 }
 0x1d2   : > { %592 = vrot.lane.b32.xlu0 %v317_v8, %s1091_s27  ;;  %s699_s27 = sshll.u32 %s695_s10, 4  ;;  %s700_s27 = int_to_ptr.hbm [resolvable:$true] %s699_s27 }
 0x221   : > { %v350_v17 = vpop.xlane.xlu0 %349 }
 0x222   : > { %v351_v18 = vsub.f32 %v347_v14, %v350_v17 }
 0x224   : > { %v352_v19 = vmul.f32 1.442695, %v351_v18 }
 0x226   : > { %904 = vpow2.f32 %v352_v19 }
 0x22c   : > { %v905_v20 = vpop.eup %904 }
 0x22d   : > { %v354_v21 = vsel %vm321_vm1, %v905_v20, 0.0 }
 0x22e   : > { %355 = vadd.xlane.f32.xlu1 %v354_v21 }
 0x234   : > { %v451_v22 = vpop.permute.xlu0 %450 }
 0x235   : > { %471 = vmatpush.msrb.mxu3 %v451_v22 }
 0x23c   : > { %v502_v38 = vpop.permute.xlu0 %501 }
 0x244   : > { %v593_v55 = vpop.permute.xlu0 %592 }
 0x247   : > { %359 = vrot.lane.b32.xlu1 %v1245_v7, %s1092_s28  ;;  %s1024_s28 = sshra.s32 %s700_s27, 4  ;;  %s1025_s28 = int_to_ptr.hbm [resolvable:$true] %s1024_s28 }
 0x248   : > { %p1031_p12 = scmp.lt.s32.totalorder %s1025_s28, %s1342_s5 }
 0x2a1   : > { %v356_v23 = vpop.xlane.xlu1 %355 }
 0x2a2   : > { %906 = vrcp.f32 %v356_v23 }
 0x2a8   : > { %v907_v24 = vpop.eup %906 }
 0x2a9   : > { %v358_v27 = vmul.f32 %v907_v24, %v905_v20 }
 0x2b9   : > { %v360_v26 = vpop.permute.xlu1 %359 }
 0x2ba   : > { %380 = vmatpush.msra.mxu2 %v360_v26 }
 0x2bb   : > { %804 = vmatmul.msk.f32.vlgmr.msra.gmra.mxu2 %vm321_vm1, %v358_v27 }
 0x2bc   : > { %806 = vmatpush.xpose.msk.msrb.mxu2 %vm321_vm1, %v413_v25 }
 0x2c3   : > { %807 = vmatmul.msk.f32.vlgmr.msrb.gmra.mxu2 %vm321_vm1, %v411_v28 }
 0x33e   : > { %v382_v29 = vpop.f32.mrf.mxu2 }
 0x33f   : > { %805 = vmatmul.msk.f32.vlgmr.msra.gmra.mxu3 %vm321_vm1, %v382_v29 }
 0x340   : > { %586 = vmatpush.msra.mxu3 %v567_v5 }
 0x346   : > { %v435_v30 = vpop.f32.mrf.mxu2 }
 0x347   : > { %v438_v31 = vsel %vm312_vm2, %v435_v30, -10000.0 }
 0x348   : > { %v439_v32 = vsel %vm321_vm1, %v438_v31, -inf }
 0x349   : > { %440 = vmax.xlane.f32.xlu2 %v439_v32 }
 0x361   : > { %503 = vrot.lane.b32.xlu2 %v1245_v7, %s1093_s29  ;;  %s1026_s29 = scalar_lea.hbm %s1025_s28, 8 }
 0x362   : > { %p1027_p1 = scmp.ne.s32.totalorder %s1025_s28, %s1026_s29  ;;  %p1032_p7 = scmp.lt.s32.totalorder %s1030_s6, %s1026_s29 }
 0x364   : > { %p1028_p3 = pnand %p1027_p1, %p1196_p4  ;;  %p1033_p8 = por %p1032_p7, %p1031_p12 }
 0x366   : > { %p1029_p5 = pneg %p1028_p3 }
 0x368   : > { %p1034_p9 = pnand %p1033_p8, %p1029_p5 }
 0x3bc   : > { %v441_v33 = vpop.xlane.xlu2 %440 }
 0x3bd   : > { %v442_v34 = vsub.f32 %v438_v31, %v441_v33 }
 0x3bf   : > { %v443_v35 = vmul.f32 1.442695, %v442_v34 }
 0x3c1   : > { %908 = vpow2.f32 %v443_v35 }
 0x3c2   : > { %v406_v51 = vpop.f32.mrf.mxu3 }
 0x3c4   : > { %v504_v36 = vpop.permute.xlu2 %503 }
 0x3c5   : > { %810 = vmatpush.xpose.msk.msrb.mxu0 %vm321_vm1, %v504_v36 }
 0x3c7   : > { %v909_v37 = vpop.eup %908 }
 0x3c8   : > { %811 = vmatmul.msk.f32.vlgmr.msrb.gmra.mxu0 %vm321_vm1, %v502_v38  ;;  %v445_v39 = vsel %vm321_vm1, %v909_v37, 0.0 }
 0x3c9   : > { %446 = vadd.xlane.f32.xlu1 %v445_v39 }
 0x3e2   : > { %594 = vrot.lane.b32.xlu1 %v1245_v7, %s1094_s30 }
 0x43c   : > { %v447_v41 = vpop.xlane.xlu1 %446 }
 0x43d   : > { %910 = vrcp.f32 %v447_v41 }
 0x443   : > { %v911_v42 = vpop.eup %910 }
 0x444   : > { %v449_v43 = vmul.f32 %v911_v42, %v909_v37 }
 0x445   : > { %v526_v44 = vpop.f32.mrf.mxu0 }
 0x446   : > { %v529_v45 = vsel %vm312_vm2, %v526_v44, -10000.0  ;;  %808 = vmatmul.msk.f32.vlgmr.msrb.gmra.mxu3 %vm321_vm1, %v449_v43 }
 0x447   : > { %v530_v46 = vsel %vm321_vm1, %v529_v45, -inf }
 0x448   : > { %531 = vmax.xlane.f32.xlu2 %v530_v46 }
 0x454   : > { %v595_v47 = vpop.permute.xlu1 %594 }
 0x455   : > { %814 = vmatpush.xpose.msk.msra.mxu1 %vm321_vm1, %v595_v47 }
 0x4bb   : > { %v532_v48 = vpop.xlane.xlu2 %531 }
 0x4bc   : > { %v533_v49 = vsub.f32 %v529_v45, %v532_v48 }
 0x4be   : > { %v534_v50 = vmul.f32 1.442695, %v533_v49 }
 0x4c0   : > { %912 = vpow2.f32 %v534_v50 }
 0x4c6   : > { %v913_v52 = vpop.eup %912 }
 0x4c7   : > { %v536_v53 = vsel %vm321_vm1, %v913_v52, 0.0 }
 0x4c8   : > { %537 = vadd.xlane.f32.xlu1 %v536_v53 }
 0x4c9   : > { %v473_v54 = vpop.f32.mrf.mxu3 }
 0x4ca   : > { %809 = vmatmul.msk.f32.vlgmr.msrb.gmra.mxu1 %vm321_vm1, %v473_v54 }
 0x4d2   : > { %815 = vmatmul.msk.f32.vlgmr.msra.gmra.mxu1 %vm321_vm1, %v593_v55 }
 0x53b   : > { %v538_v63 = vpop.xlane.xlu1 %537 }
 0x547   : > { %v497_v56 = vpop.f32.mrf.mxu1 }
 0x54f   : > { %v617_v57 = vpop.f32.mrf.mxu1 }
 0x550   : > { %v620_v58 = vsel %vm312_vm2, %v617_v57, -10000.0 }
 0x551   : > { %v621_v59 = vsel %vm321_vm1, %v620_v58, -inf }
 0x552   : > { %622 = vmax.xlane.f32.xlu0 %v621_v59 }
 0x566   : > { %541 = vrot.lane.b32.xlu0 %v1245_v7, %s1095_s16 }
 0x5c5   : > { %v623_v60 = vpop.xlane.xlu0 %622 }
 0x5c6   : > { %v624_v61 = vsub.f32 %v620_v58, %v623_v60 }
 0x5c8   : > { %v625_v62 = vmul.f32 1.442695, %v624_v61 }
 0x5ca   : > { %914 = vpow2.f32 %v625_v62 }
 0x5cb   : > { %916 = vrcp.f32 %v538_v63 }
 0x5d0   : > { %v915_v0 = vpop.eup %914 }
 0x5d1   : > { %v627_v1 = vsel %vm321_vm1, %v915_v0, 0.0  ;;  %v917_v2 = vpop.eup %916 }
 0x5d2   : > { %628 = vadd.xlane.f32.xlu2 %v627_v1  ;;  %v540_v3 = vmul.f32 %v917_v2, %v913_v52 }
 0x5d8   : > { %v542_v4 = vpop.permute.xlu0 %541 }
 0x5d9   : > { %562 = vmatpush.msra.mxu2 %v542_v4 }
 0x5da   : > { %812 = vmatmul.msk.f32.vlgmr.msra.gmra.mxu2 %vm321_vm1, %v540_v3 }
 0x5db   : > { %677 = vmatpush.msrb.mxu2 %v658_v12 }
 0x5ea   : > { %632 = vrot.lane.b32.xlu2 %v1245_v7, %s1096_s7  ;;  %v903_v7 = vld [vmem:[%s1341_s4] ss:$0 sm:$0xff] }
 0x5eb   : > { %v409_v14 = vadd.f32 %v903_v7, %v406_v51 }
 0x5ed   : > { %v500_v16 = vadd.f32 %v497_v56, %v409_v14 }
 0x645   : > { %v629_v6 = vpop.xlane.xlu2 %628 }
 0x646   : > { %918 = vrcp.f32 %v629_v6 }
 0x64c   : > { %v919_v8 = vpop.eup %918 }
 0x64d   : > { %v631_v9 = vmul.f32 %v919_v8, %v915_v0  ;;  %v633_v10 = vpop.permute.xlu2 %632 }
 0x64e   : > { %653 = vmatpush.msra.mxu0 %v633_v10 }
 0x64f   : > { %816 = vmatmul.msk.f32.vlgmr.msra.gmra.mxu0 %vm321_vm1, %v631_v9 }
 0x65d   : > { %v564_v11 = vpop.f32.mrf.mxu2 }
 0x65e   : > { %813 = vmatmul.msk.f32.vlgmr.msra.gmra.mxu3 %vm321_vm1, %v564_v11 }
 0x6cc   : > { %v655_v13 = vpop.f32.mrf.mxu0 }
 0x6cd   : > { %817 = vmatmul.msk.f32.vlgmr.msrb.gmra.mxu2 %vm321_vm1, %v655_v13 }
 0x6e1   : > { %v588_v15 = vpop.f32.mrf.mxu3 }
 0x6e2   : > { %v591_v17 = vadd.f32 %v588_v15, %v500_v16 }
 0x750   : > { %v679_v18 = vpop.f32.mrf.mxu2 }
 0x751   : > { %v682_v19 = vadd.f32 %v679_v18, %v591_v17 }
 0x753   : > { %683 = vst.msk [vmem:[%s274_s11] sm:$0xff] %vm284_vm0, %v682_v19 }
 0x754   : > { %1037 = shalt.err (!%p1034_p9)
}
 0x755   : > { %832 = dma.vmem_to_hbm [thread:$0]  (%p1196_p4), %s698_s14, 128, %s700_s27, %s685_s25  }
 0x756 PF: > { %s711_s22 = sand.u32 1, %s1068_s18   ;;  %p1349_p10 = scmp.ge.s32.totalorder %s1080_s21, 2 }
 0x757   : > { %s712_s26 = scalar_lea.sflag [#allocation4], %s711_s22 }
 0x758   : > { %p846_p13 = pnand %p1349_p10, %p1200_p6 }
 0x75a   : > { %p847_p11 = pneg %p846_p13 }
 0x75c   : > { %1063 = dma.done.wait (%p847_p11), %s712_s26, 128  }
 0x75d   : > { %1065 = vsyncadd (%p847_p11), %s712_s26, 4294967168  ;;  %p19_p0 = scmp.ge.s32.totalorder %s1170_s12, 4   ;;  %s1350_s18 = smov %s1072_s19 }
 0x75e   : > { %s1351_s19 = smov %s1076_s20  ;;  %s1352_s20 = smov %s1181_s15 }
 0x75f   : > { %s1353_s21 = smov %s1170_s12  ;;  %21 = sbr.rel (!%p19_p0) target bundleno = 6 (0x6), region = 93 }
 0x764   :  { %718 = vsyncpa [#allocation3], 1 }
 0x765   :  { %720 = vsyncpa [#allocation3 + $0x1], 1 }
 0x766   :  { %721 = vsyncpa [#allocation6], 1 }
 0x767   :  { %722 = vsyncpa [#allocation4], 1 }
 0x768   :  { %724 = vsyncpa [#allocation4 + $0x1], 1 }

</bundles_post_ra>
